<compile_context>
chip_gen: v5e
topology: v5e:2x2
jax: 0.10.0
libtpu: 0.0.40
codegen_flags: <defaults>
</compile_context>

<pallas_src>
import math

import jax
import jax.numpy as jnp
from jax import lax
from jax.experimental import pallas as pl
from jax.experimental.pallas import tpu as pltpu

# ----------------------- "default_args" (synthetic) -------------------------
PVRNN_MTRNN_SIZE = 32          # args.pvrnn_mtrnn_size
HIDDEN_SIZE      = 32          # args.hidden_size
ACTION_SHAPE     = 8           # args.action_shape
COMM_SHAPE       = 4           # last dim of prev_comm_out (only used for zeros_like)

# TODO(synk): `var()` definition not provided; assumed softplus head (explicit
# in the module) + clamp into [exp(-20), exp(2)] (standard SAC-style var()).
STD_MIN = math.exp(-20.0)
STD_MAX = math.exp(2.0)
LOG_SQRT_2PI = 0.5 * math.log(2.0 * math.pi)

MAX_TILE_N = 2048              # upper bound of the row-tile sweep
MIN_TILE_N = 128
TARGET_GRID_STEPS = 4          # keep >=4 steps for v7x's two TensorCores


# ------------------------------ helpers --------------------------------------
def _round_up(x, m):
    return ((x + m - 1) // m) * m


def _plan_tiles(n_rows, tile_n=None):
    """Pick the lane-dense row tile.  Big tiles amortize the ~0.35 us/step grid
    overhead; the clamp keeps >= TARGET_GRID_STEPS steps when there's enough
    data so both TensorCores (v7x) and the DMA double-buffer stay busy."""
    n128 = max(MIN_TILE_N, _round_up(n_rows, MIN_TILE_N))
    if tile_n is None:
        tile_n = min(MAX_TILE_N, n128)
        per_step = (n128 // TARGET_GRID_STEPS // MIN_TILE_N) * MIN_TILE_N
        if per_step >= MIN_TILE_N:
            tile_n = min(tile_n, per_step)
    tile_n = max(MIN_TILE_N, _round_up(tile_n, MIN_TILE_N))
    n_pad = _round_up(n_rows, tile_n)
    return tile_n, n_pad


def _softplus(x):
    # numerically stable softplus: log1p(exp(-|x|)) + max(x, 0)
    return jnp.log1p(jnp.exp(-jnp.abs(x))) + jnp.maximum(x, 0.0)


# ------------------------------- kernel --------------------------------------
def actor_kernel(alpha_ref, fh_ref, eps_ref,
                 w1_ref, b1_ref, w2_ref, b2_ref, wh_ref, bh_ref,
                 act_ref, logp_ref):
    x = fh_ref[...]                                         # (TM, D) bf16 row-major

    # Layer 1: W1 @ x^T via dot_general contracting the feature dim of BOTH
    # operands -> activations exit the MXU already feature-major (H, TM);
    # no explicit transpose in the kernel or the wrapper.
    h1 = lax.dot_general(w1_ref[...], x, (((1,), (1,)), ((), ())),
                         preferred_element_type=jnp.float32) + b1_ref[...]
    h1 = jnp.where(h1 >= 0.0, h1, alpha_ref[0] * h1)        # PReLU (single slope)

    h2 = jnp.dot(w2_ref[...], h1.astype(jnp.bfloat16),
                 preferred_element_type=jnp.float32) + b2_ref[...]
    h2 = jnp.where(h2 >= 0.0, h2, alpha_ref[1] * h2)

    # Fused mu|std head: one (2A, H) @ (H, TM) matmul, split on sublanes.
    head = jnp.dot(wh_ref[...], h2.astype(jnp.bfloat16),
                   preferred_element_type=jnp.float32) + bh_ref[...]
    mu = head[:ACTION_SHAPE, :]
    std = jnp.clip(_softplus(head[ACTION_SHAPE:, :]), STD_MIN, STD_MAX)

    # sample(mu, std): reparameterized mu + eps * std (eps streamed in, f32).
    eps = eps_ref[...]                                      # (A, TM) f32
    sampled = mu + eps * std
    action = jnp.tanh(sampled)

    # Normal(mu, std).log_prob(sampled) = -0.5*eps^2 - log(std) - 0.5*log(2*pi)
    # minus log(1 - tanh(sampled)^2 + 1e-6)   (exact reference form),
    # then MEAN over action dims (torch.mean(log_prob, -1)).
    log_det = jnp.log(1.0 - action * action + 1e-6)
    log_prob = -0.5 * eps * eps - jnp.log(std) - LOG_SQRT_2PI - log_det
    logp_ref[...] = jnp.sum(log_prob, axis=0, keepdims=True) * (1.0 / ACTION_SHAPE)
    act_ref[...] = action


# ------------------------------- wrapper --------------------------------------
def actor_pallas(alphas, fh_pad, eps, w1, b1, w2, b2, wh, bh, *, tile_n):
    n_pad, D = fh_pad.shape
    H = w1.shape[0]
    A2 = wh.shape[0]
    grid = (n_pad // tile_n,)

    smem = pl.BlockSpec(memory_space=pltpu.MemorySpace.SMEM)
    rows = lambda i: (i, 0)      # march over row tiles (row-major input)
    cols = lambda i: (0, i)      # march over column tiles (feature-major tensors)
    rep = lambda i: (0, 0)       # tiny weights/biases stay resident

    return pl.pallas_call(
        actor_kernel,
        out_shape=(jax.ShapeDtypeStruct((ACTION_SHAPE, n_pad), jnp.float32),
                   jax.ShapeDtypeStruct((1, n_pad), jnp.float32)),
        grid=grid,
        in_specs=[smem,                                        # alphas (2,) f32
                  pl.BlockSpec((tile_n, D), rows),             # fh  bf16 (row-major)
                  pl.BlockSpec((ACTION_SHAPE, tile_n), cols),  # eps f32 (lane-dense)
                  pl.BlockSpec((H, D), rep),                   # w1 (out, in) bf16
                  pl.BlockSpec((H, 1), rep),                   # b1 f32
                  pl.BlockSpec((H, H), rep),                   # w2 bf16
                  pl.BlockSpec((H, 1), rep),                   # b2 f32
                  pl.BlockSpec((A2, H), rep),                  # wh = [wmu; wstd] bf16
                  pl.BlockSpec((A2, 1), rep)],                 # bh = [bmu; bstd] f32
        out_specs=(pl.BlockSpec((ACTION_SHAPE, tile_n), cols),
                   pl.BlockSpec((1, tile_n), cols)),
        compiler_params=pltpu.CompilerParams(dimension_semantics=("parallel",)),
    )(alphas, fh_pad, eps, w1, b1, w2, b2, wh, bh)


def actor_forward(rgbd, comm_in, prev_action, prev_comm_out,
                  forward_hidden, action_hidden, params, key,
                  parented=True, tile_n=None):
    """Mirror of Actor.forward (parented=True path). rgbd/comm_in/prev_action
    are unused on this path (kept for signature fidelity)."""
    if forward_hidden.ndim == 2:
        forward_hidden = forward_hidden[:, None, :]           # unsqueeze(1)
    B, S, D = forward_hidden.shape
    N = B * S
    tile_n, n_pad = _plan_tiles(N, tile_n)

    # One fused cast+pad pre-pass, no transpose (kills the old double HBM pass).
    fh_pad = jnp.pad(forward_hidden.reshape(N, D).astype(jnp.bfloat16),
                     ((0, n_pad - N), (0, 0)))
    # eps drawn directly in the feature-major layout the kernel consumes.
    eps = jax.random.normal(key, (ACTION_SHAPE, n_pad), jnp.float32)

    w1, b1, w2, b2, wh, bh, alphas = params
    actT, logpT = actor_pallas(
        alphas, fh_pad, eps,
        w1.astype(jnp.bfloat16), b1,
        w2.astype(jnp.bfloat16), b2,
        wh.astype(jnp.bfloat16), bh,
        tile_n=tile_n)

    action = actT[:, :N].T.reshape(B, S, ACTION_SHAPE)
    log_prob = logpT[0, :N].reshape(B, S, 1)

    if parented:
        comm_out = jnp.zeros_like(prev_comm_out)
        comm_log_prob = jnp.zeros_like(log_prob)
    else:
        # TODO(synk): Comm_OUT sub-module definition is not provided; only the
        # parented=True branch is implemented.
        raise NotImplementedError("Comm_OUT path not implemented")

    return action, comm_out, log_prob, comm_log_prob, action_hidden


# -------------------------- pure-f32 JAX reference ----------------------------
def actor_reference(forward_hidden, eps, params):
    """Exact f32 mirror of the PyTorch forward (same eps draws as the kernel)."""
    if forward_hidden.ndim == 2:
        forward_hidden = forward_hidden[:, None, :]
    B, S, D = forward_hidden.shape
    N = B * S
    x = forward_hidden.reshape(N, D)
    w1, b1, w2, b2, wh, bh, alphas = params
    prelu = lambda v, a: jnp.where(v >= 0, v, a * v)
    h1 = prelu(x @ w1.T + b1[:, 0], alphas[0])
    h2 = prelu(h1 @ w2.T + b2[:, 0], alphas[1])
    head = h2 @ wh.T + bh[:, 0]
    mu = head[:, :ACTION_SHAPE]
    std = jnp.clip(jax.nn.softplus(head[:, ACTION_SHAPE:]), STD_MIN, STD_MAX)
    e = eps[:, :N].T
    sampled = mu + e * std
    action = jnp.tanh(sampled)
    log_prob = (-0.5 * e * e - jnp.log(std) - LOG_SQRT_2PI
                - jnp.log(1.0 - action * action + 1e-6))
    logp = jnp.mean(log_prob, axis=-1, keepdims=True)
    return action.reshape(B, S, ACTION_SHAPE), logp.reshape(B, S, 1)


# --------------------------- parameter init ----------------------------------
def init_params(key):
    ks = jax.random.split(key, 8)

    def linear(kw, kb, fan_in, fan_out):
        # PyTorch nn.Linear native (out, in) layout == what the kernel consumes.
        bound = 1.0 / math.sqrt(fan_in)
        w = jax.random.uniform(kw, (fan_out, fan_in), jnp.float32, -bound, bound)
        b = jax.random.uniform(kb, (fan_out, 1), jnp.float32, -bound, bound)
        return w, b

    w1, b1 = linear(ks[0], ks[1], PVRNN_MTRNN_SIZE, HIDDEN_SIZE)
    w2, b2 = linear(ks[2], ks[3], HIDDEN_SIZE, HIDDEN_SIZE)
    wmu, bmu = linear(ks[4], ks[5], HIDDEN_SIZE, ACTION_SHAPE)
    wstd, bstd = linear(ks[6], ks[7], HIDDEN_SIZE, ACTION_SHAPE)
    wh = jnp.concatenate([wmu, wstd], axis=0)             # fused mu|std head (2A, H)
    bh = jnp.concatenate([bmu, bstd], axis=0)             # (2A, 1)
    alphas = jnp.full((2,), 0.25, jnp.float32)            # nn.PReLU() default slopes
    return (w1, b1, w2, b2, wh, bh, alphas)


# --------------------------------- main ---------------------------------------
if __name__ == "__main__":
    key = jax.random.PRNGKey(0)
    k_param, k_fh, k_comm, k_act, k_noise = jax.random.split(key, 5)

    params = init_params(k_param)

    B = 2
    forward_hidden = jax.random.normal(k_fh, (B, PVRNN_MTRNN_SIZE), jnp.float32)  # 2-D -> unsqueezed
    prev_comm_out = jax.random.normal(k_comm, (B, 1, COMM_SHAPE), jnp.float32)
    action_hidden = jax.random.normal(k_act, (B, HIDDEN_SIZE), jnp.float32)
    # unused-on-this-path inputs (signature fidelity)
    rgbd = jnp.zeros((B, 4, 16, 16), jnp.float32)
    comm_in = jnp.zeros((B, 1, COMM_SHAPE), jnp.float32)
    prev_action = jnp.zeros((B, 1, ACTION_SHAPE), jnp.float32)

    outs = actor_forward(rgbd, comm_in, prev_action, prev_comm_out,
                         forward_hidden, action_hidden, params, k_noise,
                         parented=True)
    outs = jax.block_until_ready(outs)

    action, comm_out, log_prob, comm_log_prob, action_hidden_out = outs
    assert action.shape == (B, 1, ACTION_SHAPE)
    assert comm_out.shape == prev_comm_out.shape
    assert log_prob.shape == (B, 1, 1)
    assert comm_log_prob.shape == (B, 1, 1)
    assert action_hidden_out.shape == (B, HIDDEN_SIZE)
    assert bool(jnp.all(jnp.abs(action) <= 1.0))
    assert bool(jnp.all(jnp.isfinite(log_prob)))

    # Tolerance check vs. a pure-f32 reference using the identical eps stream
    # (kernel runs bf16 weights/activations at the MXU, f32 elementwise tail).
    _, n_pad = _plan_tiles(B * 1)
    eps = jax.random.normal(k_noise, (ACTION_SHAPE, n_pad), jnp.float32)
    ref_action, ref_logp = actor_reference(forward_hidden, eps, params)
    assert float(jnp.max(jnp.abs(action - ref_action))) < 0.1
    assert float(jnp.max(jnp.abs(log_prob - ref_logp))) < 0.2

    print("KERNEL_OK")
</pallas_src>

<mosaic_0001>
module attributes {stable_mosaic.version = 11 : i64} {
  func.func @actor_kernel(%arg0: i32, %arg1: memref<2xf32, #tpu.memory_space<smem>>, %arg2: memref<128x32xbf16, #tpu.memory_space<vmem>>, %arg3: memref<8x128xf32, #tpu.memory_space<vmem>>, %arg4: memref<32x32xbf16, #tpu.memory_space<vmem>>, %arg5: memref<32x1xf32, #tpu.memory_space<vmem>>, %arg6: memref<32x32xbf16, #tpu.memory_space<vmem>>, %arg7: memref<32x1xf32, #tpu.memory_space<vmem>>, %arg8: memref<16x32xbf16, #tpu.memory_space<vmem>>, %arg9: memref<16x1xf32, #tpu.memory_space<vmem>>, %arg10: memref<8x128xf32, #tpu.memory_space<vmem>>, %arg11: memref<1x128xf32, #tpu.memory_space<vmem>>) attributes {dimension_semantics = [#tpu.dimension_semantics<parallel>], iteration_bounds = array<i64: 1>, scalar_prefetch = 0 : i64, scratch_operands = 0 : i64, tpu.core_type = #tpu.core_type<tc>, window_params = [{transform_indices = @transform_0, window_bounds = array<i64: 2>}, {transform_indices = @transform_1, window_bounds = array<i64: 128, 32>}, {transform_indices = @transform_2, window_bounds = array<i64: 8, 128>}, {pipeline_mode = #tpu.pipeline_mode<synchronous>, transform_indices = @transform_3, window_bounds = array<i64: 32, 32>}, {pipeline_mode = #tpu.pipeline_mode<synchronous>, transform_indices = @transform_4, window_bounds = array<i64: 32, 1>}, {pipeline_mode = #tpu.pipeline_mode<synchronous>, transform_indices = @transform_5, window_bounds = array<i64: 32, 32>}, {pipeline_mode = #tpu.pipeline_mode<synchronous>, transform_indices = @transform_6, window_bounds = array<i64: 32, 1>}, {pipeline_mode = #tpu.pipeline_mode<synchronous>, transform_indices = @transform_7, window_bounds = array<i64: 16, 32>}, {pipeline_mode = #tpu.pipeline_mode<synchronous>, transform_indices = @transform_8, window_bounds = array<i64: 16, 1>}, {transform_indices = @transform_9, window_bounds = array<i64: 8, 128>}, {transform_indices = @transform_10, window_bounds = array<i64: 1, 128>}]} {
    %c0 = arith.constant 0 : index
    %c0_0 = arith.constant 0 : index
    %0 = vector.load %arg2[%c0, %c0_0] : memref<128x32xbf16, #tpu.memory_space<vmem>>, vector<128x32xbf16>
    %c0_1 = arith.constant 0 : index
    %c0_2 = arith.constant 0 : index
    %1 = vector.load %arg4[%c0_1, %c0_2] : memref<32x32xbf16, #tpu.memory_space<vmem>>, vector<32x32xbf16>
    %cst = arith.constant dense<0.000000e+00> : vector<32x128xf32>
    %2 = tpu.matmul %1, %0, %cst {dimension_numbers = #tpu.dot_dimension_numbers<[1], [1], [0], [0], [0, 0, 1, 0], [], []>} : vector<32x32xbf16>, vector<128x32xbf16>, vector<32x128xf32> -> vector<32x128xf32>
    %c0_3 = arith.constant 0 : index
    %c0_4 = arith.constant 0 : index
    %3 = vector.load %arg5[%c0_3, %c0_4] : memref<32x1xf32, #tpu.memory_space<vmem>>, vector<32x1xf32>
    %4 = vector.broadcast %3 : vector<32x1xf32> to vector<32x128xf32>
    %5 = arith.addf %2, %4 : vector<32x128xf32>
    %cst_5 = arith.constant 0.000000e+00 : f32
    %6 = vector.broadcast %cst_5 : f32 to vector<32x128xf32>
    %7 = arith.cmpf oge, %5, %6 : vector<32x128xf32>
    %c0_6 = arith.constant 0 : index
    %8 = memref.load %arg1[%c0_6] : memref<2xf32, #tpu.memory_space<smem>>
    %9 = vector.broadcast %8 : f32 to vector<32x128xf32>
    %10 = arith.mulf %9, %5 : vector<32x128xf32>
    %11 = arith.select %7, %5, %10 : vector<32x128xi1>, vector<32x128xf32>
    %c0_7 = arith.constant 0 : index
    %c0_8 = arith.constant 0 : index
    %12 = vector.load %arg6[%c0_7, %c0_8] : memref<32x32xbf16, #tpu.memory_space<vmem>>, vector<32x32xbf16>
    %13 = arith.truncf %11 : vector<32x128xf32> to vector<32x128xbf16>
    %cst_9 = arith.constant dense<0.000000e+00> : vector<32x128xf32>
    %14 = tpu.matmul %12, %13, %cst_9 {dimension_numbers = #tpu.dot_dimension_numbers<[1], [0], [0], [1], [0, 0, 1, 1], [], []>} : vector<32x32xbf16>, vector<32x128xbf16>, vector<32x128xf32> -> vector<32x128xf32>
    %c0_10 = arith.constant 0 : index
    %c0_11 = arith.constant 0 : index
    %15 = vector.load %arg7[%c0_10, %c0_11] : memref<32x1xf32, #tpu.memory_space<vmem>>, vector<32x1xf32>
    %16 = vector.broadcast %15 : vector<32x1xf32> to vector<32x128xf32>
    %17 = arith.addf %14, %16 : vector<32x128xf32>
    %cst_12 = arith.constant 0.000000e+00 : f32
    %18 = vector.broadcast %cst_12 : f32 to vector<32x128xf32>
    %19 = arith.cmpf oge, %17, %18 : vector<32x128xf32>
    %c1 = arith.constant 1 : index
    %20 = memref.load %arg1[%c1] : memref<2xf32, #tpu.memory_space<smem>>
    %21 = vector.broadcast %20 : f32 to vector<32x128xf32>
    %22 = arith.mulf %21, %17 : vector<32x128xf32>
    %23 = arith.select %19, %17, %22 : vector<32x128xi1>, vector<32x128xf32>
    %c0_13 = arith.constant 0 : index
    %c0_14 = arith.constant 0 : index
    %24 = vector.load %arg8[%c0_13, %c0_14] : memref<16x32xbf16, #tpu.memory_space<vmem>>, vector<16x32xbf16>
    %25 = arith.truncf %23 : vector<32x128xf32> to vector<32x128xbf16>
    %cst_15 = arith.constant dense<0.000000e+00> : vector<16x128xf32>
    %26 = tpu.matmul %24, %25, %cst_15 {dimension_numbers = #tpu.dot_dimension_numbers<[1], [0], [0], [1], [0, 0, 1, 1], [], []>} : vector<16x32xbf16>, vector<32x128xbf16>, vector<16x128xf32> -> vector<16x128xf32>
    %c0_16 = arith.constant 0 : index
    %c0_17 = arith.constant 0 : index
    %27 = vector.load %arg9[%c0_16, %c0_17] : memref<16x1xf32, #tpu.memory_space<vmem>>, vector<16x1xf32>
    %28 = vector.broadcast %27 : vector<16x1xf32> to vector<16x128xf32>
    %29 = arith.addf %26, %28 : vector<16x128xf32>
    %30 = vector.extract_strided_slice %29 {offsets = [0, 0], sizes = [8, 128], strides = [1, 1]} : vector<16x128xf32> to vector<8x128xf32>
    %31 = vector.extract_strided_slice %29 {offsets = [8, 0], sizes = [8, 128], strides = [1, 1]} : vector<16x128xf32> to vector<8x128xf32>
    %32 = math.absf %31 : vector<8x128xf32>
    %cst_18 = arith.constant 0.000000e+00 : f32
    %33 = vector.broadcast %cst_18 : f32 to vector<8x128xf32>
    %34 = arith.subf %33, %32 : vector<8x128xf32>
    %35 = math.exp %34 : vector<8x128xf32>
    %36 = math.log1p %35 : vector<8x128xf32>
    %cst_19 = arith.constant 0.000000e+00 : f32
    %37 = vector.broadcast %cst_19 : f32 to vector<8x128xf32>
    %38 = arith.maximumf %31, %37 : vector<8x128xf32>
    %39 = arith.addf %36, %38 : vector<8x128xf32>
    %cst_20 = arith.constant 2.06115369E-9 : f32
    %cst_21 = arith.constant 7.3890562 : f32
    %40 = vector.broadcast %cst_20 : f32 to vector<8x128xf32>
    %41 = arith.maximumf %40, %39 : vector<8x128xf32>
    %42 = vector.broadcast %cst_21 : f32 to vector<8x128xf32>
    %43 = arith.minimumf %42, %41 : vector<8x128xf32>
    %c0_22 = arith.constant 0 : index
    %c0_23 = arith.constant 0 : index
    %44 = vector.load %arg3[%c0_22, %c0_23] : memref<8x128xf32, #tpu.memory_space<vmem>>, vector<8x128xf32>
    %45 = arith.mulf %44, %43 : vector<8x128xf32>
    %46 = arith.addf %30, %45 : vector<8x128xf32>
    %47 = math.tanh %46 : vector<8x128xf32>
    %48 = arith.mulf %47, %47 : vector<8x128xf32>
    %cst_24 = arith.constant 1.000000e+00 : f32
    %49 = vector.broadcast %cst_24 : f32 to vector<8x128xf32>
    %50 = arith.subf %49, %48 : vector<8x128xf32>
    %cst_25 = arith.constant 9.99999997E-7 : f32
    %51 = vector.broadcast %cst_25 : f32 to vector<8x128xf32>
    %52 = arith.addf %50, %51 : vector<8x128xf32>
    %53 = math.log %52 : vector<8x128xf32>
    %cst_26 = arith.constant -5.000000e-01 : f32
    %54 = vector.broadcast %cst_26 : f32 to vector<8x128xf32>
    %55 = arith.mulf %54, %44 : vector<8x128xf32>
    %56 = arith.mulf %55, %44 : vector<8x128xf32>
    %57 = math.log %43 : vector<8x128xf32>
    %58 = arith.subf %56, %57 : vector<8x128xf32>
    %cst_27 = arith.constant 0.918938517 : f32
    %59 = vector.broadcast %cst_27 : f32 to vector<8x128xf32>
    %60 = arith.subf %58, %59 : vector<8x128xf32>
    %61 = arith.subf %60, %53 : vector<8x128xf32>
    %cst_28 = arith.constant dense<0.000000e+00> : vector<128xf32>
    %62 = vector.multi_reduction <add>, %61, %cst_28 [0] : vector<8x128xf32> to vector<128xf32>
    %63 = vector.shape_cast %62 : vector<128xf32> to vector<1x128xf32>
    %cst_29 = arith.constant 1.250000e-01 : f32
    %64 = vector.broadcast %cst_29 : f32 to vector<1x128xf32>
    %65 = arith.mulf %63, %64 : vector<1x128xf32>
    %c0_30 = arith.constant 0 : index
    %c0_31 = arith.constant 0 : index
    %66 = vector.load %arg11[%c0_30, %c0_31] : memref<1x128xf32, #tpu.memory_space<vmem>>, vector<1x128xf32>
    tpu.vector_store %arg11[%c0_30, %c0_31], %65 {strides = array<i32>} : memref<1x128xf32, #tpu.memory_space<vmem>>, vector<1x128xf32>,
    %c0_32 = arith.constant 0 : index
    %c0_33 = arith.constant 0 : index
    %67 = vector.load %arg10[%c0_32, %c0_33] : memref<8x128xf32, #tpu.memory_space<vmem>>, vector<8x128xf32>
    tpu.vector_store %arg10[%c0_32, %c0_33], %47 {strides = array<i32>} : memref<8x128xf32, #tpu.memory_space<vmem>>, vector<8x128xf32>,
    return
  }
  func.func @transform_0(%arg0: i32) -> i32 {
    %c0_i32 = arith.constant 0 : i32
    %c0_i32_0 = arith.constant 0 : i32
    return %c0_i32 : i32
  }
  func.func @transform_1(%arg0: i32) -> (i32, i32) {
    %c0_i32 = arith.constant 0 : i32
    %c0_i32_0 = arith.constant 0 : i32
    return %arg0, %c0_i32 : i32, i32
  }
  func.func @transform_2(%arg0: i32) -> (i32, i32) {
    %c0_i32 = arith.constant 0 : i32
    %c0_i32_0 = arith.constant 0 : i32
    return %c0_i32, %arg0 : i32, i32
  }
  func.func @transform_3(%arg0: i32) -> (i32, i32) {
    %c0_i32 = arith.constant 0 : i32
    %c0_i32_0 = arith.constant 0 : i32
    %c0_i32_1 = arith.constant 0 : i32
    return %c0_i32, %c0_i32_0 : i32, i32
  }
  func.func @transform_4(%arg0: i32) -> (i32, i32) {
    %c0_i32 = arith.constant 0 : i32
    %c0_i32_0 = arith.constant 0 : i32
    %c0_i32_1 = arith.constant 0 : i32
    return %c0_i32, %c0_i32_0 : i32, i32
  }
  func.func @transform_5(%arg0: i32) -> (i32, i32) {
    %c0_i32 = arith.constant 0 : i32
    %c0_i32_0 = arith.constant 0 : i32
    %c0_i32_1 = arith.constant 0 : i32
    return %c0_i32, %c0_i32_0 : i32, i32
  }
  func.func @transform_6(%arg0: i32) -> (i32, i32) {
    %c0_i32 = arith.constant 0 : i32
    %c0_i32_0 = arith.constant 0 : i32
    %c0_i32_1 = arith.constant 0 : i32
    return %c0_i32, %c0_i32_0 : i32, i32
  }
  func.func @transform_7(%arg0: i32) -> (i32, i32) {
    %c0_i32 = arith.constant 0 : i32
    %c0_i32_0 = arith.constant 0 : i32
    %c0_i32_1 = arith.constant 0 : i32
    return %c0_i32, %c0_i32_0 : i32, i32
  }
  func.func @transform_8(%arg0: i32) -> (i32, i32) {
    %c0_i32 = arith.constant 0 : i32
    %c0_i32_0 = arith.constant 0 : i32
    %c0_i32_1 = arith.constant 0 : i32
    return %c0_i32, %c0_i32_0 : i32, i32
  }
  func.func @transform_9(%arg0: i32) -> (i32, i32) {
    %c0_i32 = arith.constant 0 : i32
    %c0_i32_0 = arith.constant 0 : i32
    return %c0_i32, %arg0 : i32, i32
  }
  func.func @transform_10(%arg0: i32) -> (i32, i32) {
    %c0_i32 = arith.constant 0 : i32
    %c0_i32_0 = arith.constant 0 : i32
    return %c0_i32, %arg0 : i32, i32
  }
}

</mosaic_0001>

<bundles_post_ra>
// kernel: tpu_custom_call.1
= control target key start
LH: loop header
LB: loop body
LE: loop exit
PB: predicated region body
PF: predicated region fallthrough
CT: control target
= control target key end

     0   :  { %16 = vsyncpa [#allocation4], 0  ;;  %s716_s0 = inlined_call_operand.vmem [shape: f32[2], index: 0, kind: input, shape index: {}]   ;;  %s717_s1 = inlined_call_operand.vmem [shape: bf16[128,32], index: 1, kind: input, shape index: {}]   ;;  %s718_s2 = inlined_call_operand.vmem [shape: f32[8,128], index: 2, kind: input, shape index: {}]   ;;  %s719_s3 = inlined_call_operand.vmem [shape: bf16[32,32], index: 3, kind: input, shape index: {}]   ;;  %s720_s4 = inlined_call_operand.vmem [shape: f32[32,1], index: 4, kind: input, shape index: {}]   ;;  %s721_s5 = inlined_call_operand.vmem [shape: bf16[32,32], index: 5, kind: input, shape index: {}]   ;;  %s722_s6 = inlined_call_operand.vmem [shape: f32[32,1], index: 6, kind: input, shape index: {}]   ;;  %s723_s7 = inlined_call_operand.vmem [shape: bf16[16,32], index: 7, kind: input, shape index: {}]   ;;  %s724_s8 = inlined_call_operand.vmem [shape: f32[16,1], index: 8, kind: input, shape index: {}]   ;;  %s725_s9 = inlined_call_operand.hbm [shape: f32[8,128], index: 9, kind: output, shape index: {0}]   ;;  %s726_s10 = inlined_call_operand.hbm [shape: f32[1,128], index: 10, kind: output, shape index: {1}]  }
   0x1   :  { %17 = vsyncpa [#allocation3], 0 }
   0x2   :  { %18 = vsyncpa [#allocation7], 0  ;;  %s24_s15 = sshll.u32 %s716_s0, 4  ;;  %s563_s16 = smov [#allocation2]   ;;  %s25_s15 = int_to_ptr.vmem [resolvable:$true] %s24_s15 }
   0x3   :  { %27 = dma.vmem_to_smem %s25_s15, 16, %s563_s16, [#allocation4]  }
   0x4   :  { %557 = dma.done.wait [#allocation4], 16  }
   0x5   :  { %558 = vsyncadd [#allocation4], 4294967280 }
   0x6   :  { %48 = sfence }
   0x7   :  { %v466_v0 = vld [vmem:[%s717_s1 + $0x38] sm:$0xff]  ;;  %vm144_vm0 = vcmask 261120   ;;  %v465_v2 = vld [vmem:[%s717_s1 + $0x30] sm:$0xff]  ;;  %v464_v4 = vld [vmem:[%s717_s1 + $0x28] sm:$0xff]  ;;  %v564_v8 = vmov 0   ;;  %s452_s16 = sld [smem:[#allocation2 + $0x1]] }
   0x8   :  { %v173_v1 = vsel %vm144_vm0, %v466_v0, 0  ;;  %v170_v3 = vsel %vm144_vm0, %v465_v2, 0  ;;  %v167_v5 = vsel %vm144_vm0, %v464_v4, 0  ;;  %v72_v6 = vld [vmem:[%s720_s4 + $0x10] sm:$0xff]  ;;  %v463_v7 = vld [vmem:[%s717_s1 + $0x20] sm:$0xff]  ;;  %484 = vset.pattern.permute.xlu0 %v564_v8  ;;  %485 = vset.pattern.permute.xlu1 %v564_v8  ;;  %v462_v10 = vld [vmem:[%s717_s1 + $0x18] sm:$0xff] }
   0x9   :  { %175 = vmatpush.bf16.xpose.msra.mxu0 %v173_v1  ;;  %472 = vmatpush.bf16.xpose.msra.mxu3 %v173_v1  ;;  %v164_v9 = vsel %vm144_vm0, %v463_v7, 0  ;;  %v161_v11 = vsel %vm144_vm0, %v462_v10, 0  ;;  %v73_v12 = vld [vmem:[%s720_s4 + $0x18] sm:$0xff]  ;;  %v70_v13 = vld [vmem:[%s720_s4] sm:$0xff]  ;;  %v461_v14 = vld [vmem:[%s717_s1 + $0x10] sm:$0xff]  ;;  %s565_s18 = smov [#allocation5]  }
   0xa   :  { %86 = vperm.xlu0 %484, %v72_v6   ;;  %486 = vset.pattern.permute.xlu2 %v564_v8  ;;  %v158_v15 = vsel %vm144_vm0, %v461_v14, 0  ;;  %v214_v16 = vld [vmem:[%s722_s6] sm:$0xff]  ;;  %v71_v17 = vld [vmem:[%s720_s4 + $0x8] sm:$0xff]  ;;  %v216_v36 = vld [vmem:[%s722_s6 + $0x10] sm:$0xff]  ;;  %s372_s19 = sshll.u32 %s565_s18, 4  ;;  %s374_s21 = sshll.u32 %s725_s9, 4  ;;  %s373_s19 = int_to_ptr.vmem [resolvable:$true] %s372_s19  ;;  %s375_s21 = int_to_ptr.hbm [resolvable:$true] %s374_s21 }
   0xb   :  { %76 = vperm.xlu1 %485, %v70_v13   ;;  %v460_v18 = vld [vmem:[%s717_s1 + $0x8] sm:$0xff]  ;;  %v291_v20 = vld [vmem:[%s724_s8] sm:$0xff]  ;;  %230 = vperm.xlu2 %486, %v216_v36   ;;  %v217_v46 = vld [vmem:[%s722_s6 + $0x18] sm:$0xff]  ;;  %s385_s23 = sshll.u32 %s726_s10, 4  ;;  %s386_s23 = int_to_ptr.hbm [resolvable:$true] %s385_s23 }
   0xc   :  { %v155_v19 = vsel %vm144_vm0, %v460_v18, 0  ;;  %v215_v21 = vld [vmem:[%s722_s6 + $0x8] sm:$0xff]  ;;  %v459_v22 = vld [vmem:[%s717_s1] sm:$0xff]  ;;  %s198_s1 = sld [smem:[#allocation2]] }
   0xd   :  { %v152_v23 = vsel %vm144_vm0, %v459_v22, 0  ;;  %v467_v24 = vld [vmem:[%s719_s3] sm:$0xff]  ;;  %v468_v25 = vld [vmem:[%s719_s3 + $0x8] sm:$0xff]  ;;  %v278_v62 = vstv %s452_s16 }
   0xe   :  { %v469_v51 = vld [vmem:[%s721_s5] sm:$0xff]  ;;  %v292_v52 = vld [vmem:[%s724_s8 + $0x8] sm:$0xff] }
   0xf   :  { %v470_v53 = vld [vmem:[%s721_s5 + $0x8] sm:$0xff]  ;;  %v471_v13 = vld [vmem:[%s723_s7] sm:$0xff] }
  0x11   :  { %176 = vmatpush.bf16.xpose.msra.mxu0 %v170_v3  ;;  %473 = vmatpush.bf16.xpose.msra.mxu3 %v170_v3 }
  0x12   :  { %91 = vperm.xlu0 %484, %v73_v12   ;;  %v199_v32 = vstv %s198_s1 }
  0x13   :  { %81 = vperm.xlu1 %485, %v71_v17   ;;  %235 = vperm.xlu2 %486, %v217_v46  }
  0x19   :  { %177 = vmatpush.bf16.xpose.msra.mxu0 %v167_v5  ;;  %474 = vmatpush.bf16.xpose.msra.mxu3 %v167_v5 }
  0x1a   :  { %220 = vperm.xlu0 %484, %v214_v16  }
  0x1b   :  { %225 = vperm.xlu1 %485, %v215_v21   ;;  %300 = vperm.xlu2 %486, %v292_v52  }
  0x21   :  { %178 = vmatpush.bf16.xpose.msra.mxu0 %v164_v9  ;;  %475 = vmatpush.bf16.xpose.msra.mxu3 %v164_v9 }
  0x22   :  { %295 = vperm.xlu0 %484, %v291_v20  }
  0x29   :  { %179 = vmatpush.bf16.xpose.msra.mxu0 %v161_v11  ;;  %476 = vmatpush.bf16.xpose.msra.mxu3 %v161_v11 }
  0x31   :  { %180 = vmatpush.bf16.xpose.msra.mxu0 %v158_v15  ;;  %477 = vmatpush.bf16.xpose.msra.mxu3 %v158_v15 }
  0x39   :  { %181 = vmatpush.bf16.xpose.msra.mxu0 %v155_v19  ;;  %478 = vmatpush.bf16.xpose.msra.mxu3 %v155_v19 }
  0x41   :  { %182 = vmatpush.bf16.xpose.msra.mxu0 %v152_v23  ;;  %479 = vmatpush.bf16.xpose.msra.mxu3 %v152_v23 }
  0x48   :  { %440 = vmatmul.msk.bf16.vlgmr.msra.gmra.mxu0 %vm144_vm0, %v467_v24  ;;  %441 = vmatmul.msk.bf16.vlgmr.msra.gmra.mxu3 %vm144_vm0, %v468_v25 }
  0x65   :  { %v231_v56 = vpop.permute.xlu2 %230 }
  0x6d   :  { %v236_v63 = vpop.permute.xlu2 %235 }
  0x75   :  { %v301_v15 = vpop.permute.xlu2 %300 }
  0x7c   :  { %v87_v28 = vpop.permute.xlu0 %86 }
  0x7d   :  { %v77_v27 = vpop.permute.xlu1 %76 }
  0x84   :  { %v92_v37 = vpop.permute.xlu0 %91 }
  0x85   :  { %v82_v33 = vpop.permute.xlu1 %81 }
  0x8c   :  { %v221_v60 = vpop.permute.xlu0 %220 }
  0x8d   :  { %v226_v59 = vpop.permute.xlu1 %225 }
  0xc5   :  { %v184_v26 = vpop.f32.mrf.mxu0 }
  0xc6   :  { %v185_v34 = vadd.f32 %v184_v26, %v77_v27 }
  0xc8   :  { %v200_v41 = vmul.f32 %v199_v32, %v185_v34  ;;  %vm194_vm3 = vcmp.ge.f32.partialorder %v185_v34, 0.0 }
  0xca   :  { %v204_v48 = vsel %vm194_vm3, %v185_v34, %v200_v41 }
  0xcb   :  { %v189_v29 = vpop.f32.mrf.mxu3 }
  0xcc   :  { %v190_v31 = vadd.f32 %v189_v29, %v87_v28 }
  0xcd   :  { %v186_v30 = vpop.f32.mrf.mxu0 }
  0xce   :  { %v187_v35 = vadd.f32 %v186_v30, %v82_v33  ;;  %v202_v39 = vmul.f32 %v199_v32, %v190_v31  ;;  %vm196_vm1 = vcmp.ge.f32.partialorder %v190_v31, 0.0  ;;  %v342_v33 = vld [vmem:[%s718_s2] sm:$0xff]  ;;  %s566_s2 = smov [#allocation6]  }
  0xcf   :  { %v351_v41 = vmul.f32 -0.5, %v342_v33  ;;  %s383_s9 = sshll.u32 %s566_s2, 4  ;;  %s384_s9 = int_to_ptr.vmem [resolvable:$true] %s383_s9 }
  0xd0   :  { %v201_v42 = vmul.f32 %v199_v32, %v187_v35  ;;  %vm195_vm4 = vcmp.ge.f32.partialorder %v187_v35, 0.0  ;;  %v206_v44 = vsel %vm196_vm1, %v190_v31, %v202_v39 }
  0xd2   :  { %v205_v49 = vsel %vm195_vm4, %v187_v35, %v201_v42  ;;  %v296_v35 = vpop.permute.xlu0 %295 }
  0xd3   :  { %v191_v38 = vpop.f32.mrf.mxu3  ;;  %v212_v50 = vpack.c.bf16 %v205_v49, %v204_v48 }
  0xd4   :  { %v192_v40 = vadd.f32 %v191_v38, %v92_v37 }
  0xd6   :  { %v203_v43 = vmul.f32 %v199_v32, %v192_v40  ;;  %vm197_vm2 = vcmp.ge.f32.partialorder %v192_v40, 0.0 }
  0xd8   :  { %v207_v45 = vsel %vm197_vm2, %v192_v40, %v203_v43 }
  0xd9   :  { %v213_v47 = vpack.c.bf16 %v207_v45, %v206_v44  ;;  %v352_v45 = vmul.f32 %v351_v41, %v342_v33 }
  0xdb   :  { %260 = vmatpush.bf16.msra.mxu1 %v213_v47 }
  0xdf   :  { %261 = vmatpush.bf16.msra.mxu1 %v212_v50 }
  0xe2   :  { %450 = vmatmul.msk.bf16.vlgmr.msra.gmra.mxu1 %vm144_vm0, %v469_v51 }
  0xf2   :  { %451 = vmatmul.msk.bf16.gmra.mxu1 %vm144_vm0, %v470_v53 }
 0x15f   :  { %v263_v54 = vpop.f32.mrf.mxu1 }
 0x160   :  { %v264_v1 = vadd.f32 %v263_v54, %v221_v60 }
 0x162   :  { %v279_v6 = vmul.f32 %v278_v62, %v264_v1  ;;  %vm273_vm8 = vcmp.ge.f32.partialorder %v264_v1, 0.0 }
 0x164   :  { %v283_v11 = vsel %vm273_vm8, %v264_v1, %v279_v6 }
 0x167   :  { %v265_v55 = vpop.f32.mrf.mxu1 }
 0x168   :  { %v266_v61 = vadd.f32 %v265_v55, %v226_v59 }
 0x16a   :  { %v280_v4 = vmul.f32 %v278_v62, %v266_v61  ;;  %vm274_vm7 = vcmp.ge.f32.partialorder %v266_v61, 0.0 }
 0x16c   :  { %v284_v10 = vsel %vm274_vm7, %v266_v61, %v280_v4 }
 0x16d   :  { %v289_v12 = vpack.c.bf16 %v284_v10, %v283_v11 }
 0x16f   :  { %v268_v57 = vpop.f32.mrf.mxu1 }
 0x170   :  { %v269_v58 = vadd.f32 %v268_v57, %v231_v56 }
 0x172   :  { %v281_v2 = vmul.f32 %v278_v62, %v269_v58  ;;  %vm275_vm5 = vcmp.ge.f32.partialorder %v269_v58, 0.0 }
 0x174   :  { %v285_v7 = vsel %vm275_vm5, %v269_v58, %v281_v2 }
 0x177   :  { %v270_v0 = vpop.f32.mrf.mxu1 }
 0x178   :  { %v271_v3 = vadd.f32 %v270_v0, %v236_v63 }
 0x17a   :  { %v282_v5 = vmul.f32 %v278_v62, %v271_v3  ;;  %vm276_vm6 = vcmp.ge.f32.partialorder %v271_v3, 0.0 }
 0x17c   :  { %v286_v8 = vsel %vm276_vm6, %v271_v3, %v282_v5 }
 0x17d   :  { %v290_v9 = vpack.c.bf16 %v286_v8, %v285_v7 }
 0x17f   :  { %317 = vmatpush.bf16.msra.mxu2 %v290_v9 }
 0x183   :  { %318 = vmatpush.bf16.msra.mxu2 %v289_v12 }
 0x186   :  { %457 = vmatmul.msk.bf16.vlgmr.msra.gmra.mxu2 %vm144_vm0, %v471_v13 }
 0x209   :  { %v320_v14 = vpop.f32.mrf.mxu2 }
 0x20a   :  { %v321_v36 = vadd.f32 %v320_v14, %v296_v35 }
 0x211   :  { %v322_v16 = vpop.f32.mrf.mxu2 }
 0x212   :  { %v323_v17 = vadd.f32 %v322_v16, %v301_v15 }
 0x214   :  { %v325_v18 = vand.u32 2147483647, %v323_v17  ;;  %v338_v29 = vmax.f32 %v323_v17, 0.0 }
 0x216   :  { %v326_v19 = vsub.f32 0.0, %v325_v18 }
 0x218   :  { %v327_v20 = vmul.f32 1.442695, %v326_v19 }
 0x21a   :  { %487 = vpow2.f32 %v327_v20 }
 0x220   :  { %v488_v21 = vpop.eup %487 }
 0x221   :  { %v329_v22 = vadd.f32 1.0, %v488_v21  ;;  %v332_v23 = vmul.f32 -0.5, %v488_v21  ;;  %v335_v25 = vand.u32 2147483647, %v488_v21 }
 0x223   :  { %489 = vlog2.f32 %v329_v22  ;;  %v333_v24 = vadd.f32 1.0, %v332_v23  ;;  %vm336_vm9 = vcmp.lt.f32.partialorder %v335_v25, 0.0004427343 }
 0x225   :  { %v334_v28 = vmul.f32 %v488_v21, %v333_v24 }
 0x229   :  { %v490_v26 = vpop.eup %489 }
 0x22a   :  { %v331_v27 = vmul.f32 0.6931472, %v490_v26 }
 0x22c   :  { %v337_v30 = vsel %vm336_vm9, %v334_v28, %v331_v27 }
 0x22d   :  { %v339_v31 = vadd.f32 %v338_v29, %v337_v30 }
 0x22f   :  { %v340_v32 = vmax.f32 %v339_v31, 2.0611537e-09 }
 0x231   :  { %v341_v34 = vmin.f32 %v340_v32, 7.389056 }
 0x233   :  { %v343_v37 = vmul.f32 %v342_v33, %v341_v34 }
 0x235   :  { %v344_v38 = vadd.f32 %v343_v37, %v321_v36 }
 0x237   :  { %491 = vtanh.f32 %v344_v38 }
 0x238   :  { %493 = vlog2.f32 %v341_v34 }
 0x23d   :  { %v492_v39 = vpop.eup %491 }
 0x23e   :  { %366 = vst [vmem:[#allocation5] sm:$0xff] %v492_v39  ;;  %v346_v40 = vmul.f32 %v492_v39, %v492_v39  ;;  %v494_v42 = vpop.eup %493 }
 0x23f   :  { %377 = dma.vmem_to_hbm [thread:$0]  %s373_s19, 128, %s375_s21, [#allocation3]   ;;  %v354_v46 = vmul.f32 0.6931472, %v494_v42 }
 0x240   :  { %v347_v43 = vsub.f32 1.0, %v346_v40 }
 0x241   :  { %v355_v47 = vsub.f32 %v352_v45, %v354_v46 }
 0x242   :  { %v348_v44 = vadd.f32 1e-06, %v347_v43 }
 0x243   :  { %v458_v50 = vadd.f32 -0.9189385, %v355_v47 }
 0x244   :  { %495 = vlog2.f32 %v348_v44 }
 0x24a   :  { %v496_v48 = vpop.eup %495 }
 0x24b   :  { %v350_v49 = vmul.f32 0.6931472, %v496_v48 }
 0x24d   :  { %v357_v51 = vsub.f32 %v458_v50, %v350_v49 }
 0x24f   :  { %v358_v52 = vrot.slane %v357_v51, 4 }
 0x251   :  { %v359_v53 = vadd.f32 %v358_v52, %v357_v51 }
 0x253   :  { %v360_v54 = vrot.slane %v359_v53, 2 }
 0x255   :  { %v361_v55 = vadd.f32 %v360_v54, %v359_v53 }
 0x257   :  { %v362_v56 = vrot.slane %v361_v55, 1 }
 0x259   :  { %v363_v57 = vadd.f32 %v362_v56, %v361_v55 }
 0x25b   :  { %v364_v58 = vmul.f32 0.125, %v363_v57 }
 0x25d   :  { %365 = vst [vmem:[#allocation6] sm:$0x1] %v364_v58 }
 0x25e   :  { %388 = dma.vmem_to_hbm [thread:$0]  %s384_s9, 16, %s386_s23, [#allocation7]  }
 0x25f   :  { %559 = dma.done.wait [#allocation3], 128  }
 0x260   :  { %560 = vsyncadd [#allocation3], 4294967168 }
 0x261   :  { %561 = dma.done.wait [#allocation7], 16  }
 0x262   :  { %562 = vsyncadd [#allocation7], 4294967280 }
 0x263   :  { %397 = vsyncpa [#allocation3], 1 }
 0x264   :  { %398 = vsyncpa [#allocation7], 1 }
 0x265   :  { %399 = vsyncpa [#allocation4], 1 }

</bundles_post_ra>
